<compile_context>
chip_gen: v5e
topology: v5e:2x2
jax: 0.10.0
libtpu: 0.0.40
codegen_flags: <defaults>
</compile_context>

<pallas_src>
import jax
import jax.numpy as jnp
from jax import lax
from jax.experimental import pallas as pl
from jax.experimental.pallas import tpu as pltpu


def _round_up(a, m):
    return (a + m - 1) // m * m


def encoder_kernel(x_ref, wt_ref, b_ref, o_ref):
    # x_ref:  (TM, D_in)
    # wt_ref: (D_in, D_out_pad)   -- pre-transposed weight, [K, N] MXU layout
    # b_ref:  (1, D_out_pad)
    # o_ref:  (TM, D_out_pad)
    x = x_ref[...]
    wt = wt_ref[...]
    b = b_ref[...]

    # Linear: y = x @ W^T + b  (W^T was materialized once at parameter prep).
    y = jnp.dot(x, wt, preferred_element_type=jnp.float32) + b

    # F.normalize(y, dim=1, p=2): y / max(||y||_2, 1e-12).
    # rsqrt(max(sq, 1e-24)) == 1 / max(sqrt(sq), 1e-12); rsqrt runs on the EUP
    # (its own bundle slot), leaving one vmul on the VPU per element.
    # Padded lanes of y are exactly 0 (zero weight cols + zero bias), so they
    # do not perturb the row norm.
    sq = jnp.sum(y * y, axis=1, keepdims=True)
    inv = lax.rsqrt(jnp.maximum(sq, 1e-24))
    o_ref[...] = (y * inv).astype(o_ref.dtype)


def prepare_params(w1, b1):
    """One-time parameter prep (do OUTSIDE the per-step jit in real use).

    - Pads D_out up to a multiple of 128 so output tiles are lane-dense.
    - Transposes the PyTorch [D_out, D_in] weight to [D_in, D_out_pad] so the
      kernel feeds the MXU in standard [K, N] layout.
    """
    d_out, d_in = w1.shape
    d_out_pad = _round_up(d_out, 128)
    w_pad = jnp.pad(w1, ((0, d_out_pad - d_out), (0, 0)))      # [D_out_pad, D_in]
    wt_pad = jnp.transpose(w_pad)                               # [D_in, D_out_pad]
    b_pad = jnp.pad(b1, (0, d_out_pad - d_out)).reshape(1, d_out_pad)
    return wt_pad, b_pad, d_out


def encoder_net_forward(x, wt_pad, b_pad, d_out, *, tm_cap=512):
    """x: [N, D_in]; wt_pad: [D_in, D_out_pad]; b_pad: [1, D_out_pad].

    Returns (out1, out2) — identical arrays, matching the PyTorch forward.
    """
    n, d_in = x.shape
    d_out_pad = wt_pad.shape[1]

    # Row tile: multiple of 8, capped so double-buffered tiles stay small in
    # VMEM (conservative enough for v7x's 64 MiB per TC).
    tm = min(tm_cap, _round_up(n, 8))
    n_pad = _round_up(n, tm)
    if n_pad != n:
        x = jnp.pad(x, ((0, n_pad - n), (0, 0)))  # padded rows sliced off below

    grid = (n_pad // tm,)

    # Rough VMEM budget: double-buffered x & out tiles + resident weight/bias.
    est_bytes = 4 * (2 * tm * d_in + 2 * tm * d_out_pad
                     + 2 * d_in * d_out_pad + 2 * d_out_pad)
    vmem_limit = int(min(64 * 1024 * 1024, max(4 * 1024 * 1024, 2 * est_bytes)))

    out = pl.pallas_call(
        encoder_kernel,
        out_shape=jax.ShapeDtypeStruct((n_pad, d_out_pad), x.dtype),
        grid_spec=pltpu.PrefetchScalarGridSpec(
            num_scalar_prefetch=0,
            grid=grid,
            in_specs=[
                pl.BlockSpec((tm, d_in), lambda i: (i, 0)),           # x row-tile
                pl.BlockSpec((d_in, d_out_pad), lambda i: (0, 0)),    # weight^T, grid-invariant
                pl.BlockSpec((1, d_out_pad), lambda i: (0, 0)),       # bias, grid-invariant
            ],
            out_specs=pl.BlockSpec((tm, d_out_pad), lambda i: (i, 0)),
        ),
        compiler_params=pltpu.CompilerParams(
            dimension_semantics=("parallel",),   # row tiles split across TCs on v7x
            vmem_limit_bytes=vmem_limit,
        ),
    )(x, wt_pad, b_pad)

    if n_pad != n or d_out_pad != d_out:
        out = out[:n, :d_out]
    # forward() applies layers1 twice -> results are bit-identical; return the
    # same array twice instead of storing it twice from the kernel.
    return out, out


if __name__ == "__main__":
    # Small shapes consistent with the module: dims = [D_in, D_out]
    N, D_in, D_out = 8, 32, 64

    key = jax.random.PRNGKey(0)
    kx, kw, kb = jax.random.split(key, 3)

    x = jax.random.normal(kx, (N, D_in), dtype=jnp.float32)
    # PyTorch layout: weight [D_out, D_in], bias [D_out]
    bound = 1.0 / (D_in ** 0.5)
    w1 = jax.random.uniform(kw, (D_out, D_in), minval=-bound, maxval=bound,
                            dtype=jnp.float32)
    b1 = jax.random.uniform(kb, (D_out,), minval=-bound, maxval=bound,
                            dtype=jnp.float32)

    # TODO(synk): layers2 parameters exist in the module but are never used in
    # forward(), so they are intentionally not modeled here.
    wt_pad, b_pad, d_out = prepare_params(w1, b1)
    out1, out2 = encoder_net_forward(x, wt_pad, b_pad, d_out)
    jax.block_until_ready((out1, out2))

    # Correctness check vs plain-JAX reference of the PyTorch forward
    y_ref = x @ w1.T + b1
    y_ref = y_ref / jnp.maximum(
        jnp.linalg.norm(y_ref, axis=1, keepdims=True), 1e-12)
    assert out1.shape == (N, D_out) and out2.shape == (N, D_out)
    assert jnp.allclose(out1, y_ref, atol=1e-5), "out1 mismatch"
    assert jnp.allclose(out2, y_ref, atol=1e-5), "out2 mismatch"

    print("KERNEL_OK")
</pallas_src>

<mosaic_0001>
module attributes {stable_mosaic.version = 11 : i64} {
  func.func @encoder_kernel(%arg0: i32, %arg1: memref<8x32xf32, #tpu.memory_space<vmem>>, %arg2: memref<32x128xf32, #tpu.memory_space<vmem>>, %arg3: memref<1x128xf32, #tpu.memory_space<vmem>>, %arg4: memref<8x128xf32, #tpu.memory_space<vmem>>) attributes {dimension_semantics = [#tpu.dimension_semantics<parallel>], iteration_bounds = array<i64: 1>, scalar_prefetch = 0 : i64, scratch_operands = 0 : i64, tpu.core_type = #tpu.core_type<tc>, window_params = [{transform_indices = @transform_0, window_bounds = array<i64: 8, 32>}, {pipeline_mode = #tpu.pipeline_mode<synchronous>, transform_indices = @transform_1, window_bounds = array<i64: 32, 128>}, {pipeline_mode = #tpu.pipeline_mode<synchronous>, transform_indices = @transform_2, window_bounds = array<i64: 1, 128>}, {transform_indices = @transform_3, window_bounds = array<i64: 8, 128>}]} {
    %c0 = arith.constant 0 : index
    %c0_0 = arith.constant 0 : index
    %0 = vector.load %arg1[%c0, %c0_0] : memref<8x32xf32, #tpu.memory_space<vmem>>, vector<8x32xf32>
    %c0_1 = arith.constant 0 : index
    %c0_2 = arith.constant 0 : index
    %1 = vector.load %arg2[%c0_1, %c0_2] : memref<32x128xf32, #tpu.memory_space<vmem>>, vector<32x128xf32>
    %c0_3 = arith.constant 0 : index
    %c0_4 = arith.constant 0 : index
    %2 = vector.load %arg3[%c0_3, %c0_4] : memref<1x128xf32, #tpu.memory_space<vmem>>, vector<1x128xf32>
    %cst = arith.constant dense<0.000000e+00> : vector<8x128xf32>
    %3 = tpu.matmul %0, %1, %cst {dimension_numbers = #tpu.dot_dimension_numbers<[1], [0], [0], [1], [0, 0, 1, 1], [], []>} : vector<8x32xf32>, vector<32x128xf32>, vector<8x128xf32> -> vector<8x128xf32>
    %4 = vector.broadcast %2 : vector<1x128xf32> to vector<8x128xf32>
    %5 = arith.addf %3, %4 : vector<8x128xf32>
    %6 = arith.mulf %5, %5 : vector<8x128xf32>
    %cst_5 = arith.constant dense<0.000000e+00> : vector<8xf32>
    %7 = vector.multi_reduction <add>, %6, %cst_5 [1] : vector<8x128xf32> to vector<8xf32>
    %8 = vector.shape_cast %7 : vector<8xf32> to vector<8x1xf32>
    %cst_6 = arith.constant 1.000000e-24 : f32
    %9 = vector.broadcast %cst_6 : f32 to vector<8x1xf32>
    %10 = arith.maximumf %8, %9 : vector<8x1xf32>
    %11 = math.rsqrt %10 : vector<8x1xf32>
    %12 = vector.broadcast %11 : vector<8x1xf32> to vector<8x128xf32>
    %13 = arith.mulf %5, %12 : vector<8x128xf32>
    %c0_7 = arith.constant 0 : index
    %c0_8 = arith.constant 0 : index
    %14 = vector.load %arg4[%c0_7, %c0_8] : memref<8x128xf32, #tpu.memory_space<vmem>>, vector<8x128xf32>
    tpu.vector_store %arg4[%c0_7, %c0_8], %13 {strides = array<i32>} : memref<8x128xf32, #tpu.memory_space<vmem>>, vector<8x128xf32>,
    return
  }
  func.func @transform_0(%arg0: i32) -> (i32, i32) {
    %c0_i32 = arith.constant 0 : i32
    %c0_i32_0 = arith.constant 0 : i32
    return %arg0, %c0_i32 : i32, i32
  }
  func.func @transform_1(%arg0: i32) -> (i32, i32) {
    %c0_i32 = arith.constant 0 : i32
    %c0_i32_0 = arith.constant 0 : i32
    %c0_i32_1 = arith.constant 0 : i32
    return %c0_i32, %c0_i32_0 : i32, i32
  }
  func.func @transform_2(%arg0: i32) -> (i32, i32) {
    %c0_i32 = arith.constant 0 : i32
    %c0_i32_0 = arith.constant 0 : i32
    %c0_i32_1 = arith.constant 0 : i32
    return %c0_i32, %c0_i32_0 : i32, i32
  }
  func.func @transform_3(%arg0: i32) -> (i32, i32) {
    %c0_i32 = arith.constant 0 : i32
    %c0_i32_0 = arith.constant 0 : i32
    return %arg0, %c0_i32 : i32, i32
  }
}

</mosaic_0001>

<bundles_post_ra>
// kernel: tpu_custom_call.1
= control target key start
LH: loop header
LB: loop body
LE: loop exit
PB: predicated region body
PF: predicated region fallthrough
CT: control target
= control target key end

     0   :  { %8 = vsyncpa [#allocation3], 0  ;;  %s236_s0 = inlined_call_operand.hbm [shape: f32[8,32], index: 0, kind: input, shape index: {}]   ;;  %s237_s1 = inlined_call_operand.hbm [shape: f32[32,128], index: 1, kind: input, shape index: {}]   ;;  %s238_s2 = inlined_call_operand.vmem [shape: f32[1,128], index: 2, kind: input, shape index: {}]   ;;  %s239_s3 = inlined_call_operand.hbm [shape: f32[8,128], index: 3, kind: output, shape index: {}]  }
   0x1   :  { %9 = vsyncpa [#allocation6], 0 }
   0x2   :  { %10 = vsyncpa [#allocation4], 0  ;;  %s16_s14 = sshll.u32 %s236_s0, 4  ;;  %s199_s15 = smov [#allocation2]   ;;  %s17_s14 = int_to_ptr.hbm [resolvable:$true] %s16_s14 }
   0x3   :  { %s18_s16 = sshll.u32 %s199_s15, 4  ;;  %s26_s19 = sshll.u32 %s237_s1, 4  ;;  %s19_s16 = int_to_ptr.vmem [resolvable:$true] %s18_s16  ;;  %s27_s19 = int_to_ptr.hbm [resolvable:$true] %s26_s19 }
   0x4   :  { %21 = dma.hbm_to_vmem [thread:$0]  %s17_s14, 128, %s19_s16, [#allocation3]  }
   0x5   :  { %s200_s20 = smov [#allocation5]   ;;  %s201_s22 = smov 128  }
   0x6   :  { %s28_s21 = sshll.u32 %s200_s20, 4  ;;  %s202_s23 = smov 8   ;;  %s29_s21 = int_to_ptr.vmem [resolvable:$true] %s28_s21 }
   0x7   :  { %34 = dma.hbm_to_vmem [thread:$0]  %s27_s19, 512, %s29_s21, [#allocation6], %s201_s22, %s201_s22, %s202_s23  }
   0x8   :  { %193 = dma.done.wait [#allocation3], 128  }
   0x9   :  { %194 = vsyncadd [#allocation3], 4294967168 }
   0xa   :  { %195 = dma.done.wait [#allocation6], 512  }
   0xb   :  { %196 = vsyncadd [#allocation6], 4294966784  ;;  %v49_v0 = vld [vmem:[#allocation5 + $0x18] sm:$0xff]  ;;  %v48_v1 = vld [vmem:[#allocation5 + $0x10] sm:$0xff]  ;;  %vm54_vm0 = vcmask 261120   ;;  %s203_s24 = smov [#allocation7]  }
   0xc   :  { %70 = vmatpush.msra.mxu0 %v49_v0  ;;  %v47_v2 = vld [vmem:[#allocation5 + $0x8] sm:$0xff]  ;;  %v46_v3 = vld [vmem:[#allocation5] sm:$0xff]  ;;  %v45_v4 = vld [vmem:[#allocation2] sm:$0xff]  ;;  %s99_s25 = sshll.u32 %s203_s24, 4  ;;  %s100_s25 = int_to_ptr.vmem [resolvable:$true] %s99_s25 }
   0xd   :  { %v118_v5 = vld [vmem:[%s238_s2] ss:$0 sm:$0xff]  ;;  %s101_s2 = sshll.u32 %s239_s3, 4  ;;  %s102_s2 = int_to_ptr.hbm [resolvable:$true] %s101_s2 }
   0xe   :  { %71 = vmatpush.msra.mxu0 %v48_v1 }
  0x10   :  { %72 = vmatpush.msra.mxu0 %v47_v2 }
  0x12   :  { %73 = vmatpush.msra.mxu0 %v46_v3 }
  0x13   :  { %112 = vmatmul.msk.f32.vlgmr.msra.gmra.mxu0 %vm54_vm0, %v45_v4 }
  0x90   :  { %v75_v6 = vpop.f32.mrf.mxu0 }
  0x91   :  { %v76_v7 = vadd.f32 %v118_v5, %v75_v6 }
  0x93   :  { %v78_v8 = vmul.f32 %v76_v7, %v76_v7 }
  0x95   :  { %79 = vadd.xlane.f32.xlu0 %v78_v8 }
 0x108   :  { %v80_v9 = vpop.xlane.xlu0 %79 }
 0x109   :  { %v81_v10 = vmax.f32 %v80_v9, 1e-24 }
 0x10b   :  { %119 = vrsqrt.f32 %v81_v10  ;;  %vm88_vm2 = vweird.f32 %v81_v10 }
 0x111   :  { %v120_v11 = vpop.eup %119 }
 0x112   :  { %v83_v12 = vmul.f32 %v120_v11, %v81_v10  ;;  %vm89_vm1 = vweird.f32 %v120_v11 }
 0x113   :  { %vm90_vm3 = vmor %vm88_vm2, %vm89_vm1 }
 0x114   :  { %v84_v13 = vmul.f32 %v120_v11, %v83_v12 }
 0x116   :  { %v85_v14 = vmul.f32 0.5, %v84_v13 }
 0x118   :  { %v86_v15 = vsub.f32 1.5, %v85_v14 }
 0x11a   :  { %v87_v16 = vmul.f32 %v120_v11, %v86_v15 }
 0x11c   :  { %v91_v17 = vsel %vm90_vm3, %v120_v11, %v87_v16 }
 0x11d   :  { %v92_v18 = vmul.f32 %v91_v17, %v76_v7 }
 0x11f   :  { %93 = vst [vmem:[#allocation7] sm:$0xff] %v92_v18 }
 0x120   :  { %104 = dma.vmem_to_hbm [thread:$0]  %s100_s25, 128, %s102_s2, [#allocation4]  }
 0x121   :  { %197 = dma.done.wait [#allocation4], 128  }
 0x122   :  { %198 = vsyncadd [#allocation4], 4294967168 }
 0x123   :  { %109 = vsyncpa [#allocation3], 1 }
 0x124   :  { %110 = vsyncpa [#allocation6], 1 }
 0x125   :  { %111 = vsyncpa [#allocation4], 1 }

</bundles_post_ra>
